<compile_context>
chip_gen: v7x
topology: tpu7x:2x2x1
jax: 0.10.0
libtpu: 0.0.40
codegen_flags: <defaults>
</compile_context>

<pallas_src>
import jax
import jax.numpy as jnp
from jax.experimental import pallas as pl
from jax.experimental.pallas import tpu as pltpu


def _attn_kernel(x_ref, u_ref, lens_ref, o_ref):
    # x_ref   : (TB, L, H) VMEM  -- block of rnn outputs (the only large operand)
    # u_ref   : (1, H)     VMEM  -- fused projection u = W^T v (grid-invariant)
    # lens_ref: (TB, 1)    VMEM  -- int32 question lengths for this block
    # o_ref   : (TB, L)    VMEM  -- softmaxed attention weights (L on lane axis)
    x = x_ref[...].astype(jnp.float32)                 # (TB, L, H)
    u = u_ref[...].astype(jnp.float32)                 # (1, H), broadcasts

    # scores[b, l] = sum_h x[b, l, h] * u[h]   (VPU multiply + XLU lane-reduce;
    # no MXU, no energy intermediate).  Result lands as (TB, L), L on lanes.
    scores = jnp.sum(x * u, axis=-1)                   # (TB, L)

    # Length mask for all TB rows at once.
    col = jax.lax.broadcasted_iota(jnp.int32, scores.shape, 1)
    scores = jnp.where(col >= lens_ref[...], -jnp.inf, scores)
    # NOTE: a row with qlen == 0 produces NaN, matching the reference module.

    m = jnp.max(scores, axis=-1, keepdims=True)
    e = jnp.exp(scores - m)
    o_ref[...] = e / jnp.sum(e, axis=-1, keepdims=True)


def attn_for_rnn(rnn_outputs, questions_lens, W, b, v, *, block_b=None):
    """rnn_outputs: (B, L, H); questions_lens: (B,) int; W: (H, H); b: (H,);
       v: (H, 1).  Returns (B, L) f32 softmax attention weights."""
    B, L, H = rnn_outputs.shape

    # --- Algebraic fusion (tiny wrapper-side compute; no W.T materialized) ---
    # scores = x @ (W^T v) + (b . v); the (b . v) constant is dropped because a
    # per-row-uniform shift cancels exactly under softmax.
    u_row = jnp.dot(v.reshape(1, H).astype(jnp.float32),
                    W.astype(jnp.float32))                       # (1, H) == (W^T v)^T
    del b  # mathematically cancelled by softmax shift-invariance

    lens = questions_lens.astype(jnp.int32).reshape(B, 1)

    # --- rows-per-grid-step: amortize per-step overhead, stay within VMEM ---
    if block_b is None:
        itemsize = jnp.dtype(rnn_outputs.dtype).itemsize
        # double-buffered x block + output block + lens block, per batch row
        per_row = 2 * L * H * itemsize + 2 * L * 4 + 2 * 4
        cap = max(1, (12 << 20) // per_row)   # headroom under every chip's scoped VMEM
        if cap >= B:
            # whole batch fits; keep >=2 parallel steps when cleanly possible (v7x, 2 TCs)
            block_b = B // 2 if (B % 16 == 0) else B
        elif cap >= 8:
            block_b = (cap // 8) * 8          # sublane-aligned rows per step
        else:
            block_b = 8                       # extreme per-row footprint; keep 8-aligned
    TB = int(min(block_b, B))

    # Pad batch to a multiple of TB (padded rows get qlen=L: valid softmax, discarded).
    Bp = pl.cdiv(B, TB) * TB
    if Bp != B:
        pad = Bp - B
        rnn_outputs = jnp.concatenate(
            [rnn_outputs, jnp.zeros((pad, L, H), rnn_outputs.dtype)], axis=0)
        lens = jnp.concatenate([lens, jnp.full((pad, 1), L, jnp.int32)], axis=0)

    out = pl.pallas_call(
        _attn_kernel,
        out_shape=jax.ShapeDtypeStruct((Bp, L), jnp.float32),
        grid=(Bp // TB,),
        in_specs=[
            pl.BlockSpec((TB, L, H), lambda i: (i, 0, 0)),        # streamed x
            pl.BlockSpec((1, H), lambda i: (0, 0)),               # invariant u = W^T v
            pl.BlockSpec((TB, 1), lambda i: (i, 0)),              # per-row lengths
        ],
        out_specs=pl.BlockSpec((TB, L), lambda i: (i, 0)),
        compiler_params=pltpu.CompilerParams(
            dimension_semantics=("parallel",),
            vmem_limit_bytes=32 << 20,
        ),
    )(rnn_outputs, u_row, lens)
    return out[:B]


def _reference(rnn_outputs, questions_lens, W, b, v):
    # Direct transcription of the PyTorch module (including the bias term).
    B, L, H = rnn_outputs.shape
    energy = rnn_outputs.reshape(-1, H) @ W.T + b
    scores = (energy @ v).reshape(B, L)
    mask = jnp.arange(L)[None, :] >= questions_lens[:, None]
    scores = jnp.where(mask, -jnp.inf, scores)
    return jax.nn.softmax(scores, axis=1)


if __name__ == "__main__":
    hidden_size = 32
    batch_size = 2
    max_question_len = 8

    key = jax.random.PRNGKey(0)
    kx, kw, kb, kv = jax.random.split(key, 4)

    # Deterministic parameter init (xavier-normal-style scales).
    W = jax.random.normal(kw, (hidden_size, hidden_size), jnp.float32) * (
        2.0 / (hidden_size + hidden_size)) ** 0.5
    b = jax.random.normal(kb, (hidden_size,), jnp.float32) * 0.01
    v = jax.random.normal(kv, (hidden_size, 1), jnp.float32) * (
        2.0 / (hidden_size + 1)) ** 0.5

    rnn_outputs = jax.random.normal(
        kx, (batch_size, max_question_len, hidden_size), jnp.float32)
    questions_lens = jnp.array([max_question_len, 5], dtype=jnp.int32)

    out = attn_for_rnn(rnn_outputs, questions_lens, W, b, v)
    out = jax.block_until_ready(out)

    ref = _reference(rnn_outputs, questions_lens, W, b, v)
    assert out.shape == (batch_size, max_question_len)
    assert jnp.allclose(out, ref, atol=1e-5, rtol=1e-5), (out, ref)

    print("KERNEL_OK")
</pallas_src>

<mosaic_0001>
module attributes {stable_mosaic.version = 11 : i64} {
  func.func @_attn_kernel(%arg0: i32, %arg1: memref<2x8x32xf32, #tpu.memory_space<vmem>>, %arg2: memref<1x32xf32, #tpu.memory_space<vmem>>, %arg3: memref<2x1xi32, #tpu.memory_space<vmem>>, %arg4: memref<2x8xf32, #tpu.memory_space<vmem>>) attributes {dimension_semantics = [#tpu.dimension_semantics<parallel>], iteration_bounds = array<i64: 1>, scalar_prefetch = 0 : i64, scratch_operands = 0 : i64, tpu.core_type = #tpu.core_type<tc>, window_params = [{transform_indices = @transform_0, window_bounds = array<i64: 2, 8, 32>}, {pipeline_mode = #tpu.pipeline_mode<synchronous>, transform_indices = @transform_1, window_bounds = array<i64: 1, 32>}, {transform_indices = @transform_2, window_bounds = array<i64: 2, 1>}, {transform_indices = @transform_3, window_bounds = array<i64: 2, 8>}]} {
    %c0 = arith.constant 0 : index
    %c0_0 = arith.constant 0 : index
    %c0_1 = arith.constant 0 : index
    %0 = vector.load %arg1[%c0, %c0_0, %c0_1] : memref<2x8x32xf32, #tpu.memory_space<vmem>>, vector<2x8x32xf32>
    %c0_2 = arith.constant 0 : index
    %c0_3 = arith.constant 0 : index
    %1 = vector.load %arg2[%c0_2, %c0_3] : memref<1x32xf32, #tpu.memory_space<vmem>>, vector<1x32xf32>
    %2 = vector.shape_cast %1 : vector<1x32xf32> to vector<1x1x32xf32>
    %3 = vector.broadcast %2 : vector<1x1x32xf32> to vector<2x8x32xf32>
    %4 = arith.mulf %0, %3 : vector<2x8x32xf32>
    %cst = arith.constant dense<0.000000e+00> : vector<2x8xf32>
    %5 = vector.multi_reduction <add>, %4, %cst [2] : vector<2x8x32xf32> to vector<2x8xf32>
    %6 = tpu.iota {dimensions = array<i32: 1>} : vector<2x8xi32>
    %c0_4 = arith.constant 0 : index
    %c0_5 = arith.constant 0 : index
    %7 = vector.load %arg3[%c0_4, %c0_5] : memref<2x1xi32, #tpu.memory_space<vmem>>, vector<2x1xi32>
    %8 = vector.broadcast %7 : vector<2x1xi32> to vector<2x8xi32>
    %9 = arith.cmpi sge, %6, %8 : vector<2x8xi32>
    %cst_6 = arith.constant 0xFF800000 : f32
    %10 = vector.broadcast %cst_6 : f32 to vector<2x8xf32>
    %11 = arith.select %9, %10, %5 : vector<2x8xi1>, vector<2x8xf32>
    %cst_7 = arith.constant dense<0xFF800000> : vector<2xf32>
    %12 = vector.multi_reduction <maximumf>, %11, %cst_7 [1] : vector<2x8xf32> to vector<2xf32>
    %13 = vector.shape_cast %12 : vector<2xf32> to vector<2x1xf32>
    %14 = vector.broadcast %13 : vector<2x1xf32> to vector<2x8xf32>
    %15 = arith.subf %11, %14 : vector<2x8xf32>
    %16 = math.exp %15 : vector<2x8xf32>
    %cst_8 = arith.constant dense<0.000000e+00> : vector<2xf32>
    %17 = vector.multi_reduction <add>, %16, %cst_8 [1] : vector<2x8xf32> to vector<2xf32>
    %18 = vector.shape_cast %17 : vector<2xf32> to vector<2x1xf32>
    %19 = vector.broadcast %18 : vector<2x1xf32> to vector<2x8xf32>
    %20 = arith.divf %16, %19 : vector<2x8xf32>
    %c0_9 = arith.constant 0 : index
    %c0_10 = arith.constant 0 : index
    %21 = vector.load %arg4[%c0_9, %c0_10] : memref<2x8xf32, #tpu.memory_space<vmem>>, vector<2x8xf32>
    tpu.vector_store %arg4[%c0_9, %c0_10], %20 {strides = array<i32>} : memref<2x8xf32, #tpu.memory_space<vmem>>, vector<2x8xf32>,
    return
  }
  func.func @transform_0(%arg0: i32) -> (i32, i32, i32) {
    %c0_i32 = arith.constant 0 : i32
    %c0_i32_0 = arith.constant 0 : i32
    %c0_i32_1 = arith.constant 0 : i32
    return %arg0, %c0_i32, %c0_i32_0 : i32, i32, i32
  }
  func.func @transform_1(%arg0: i32) -> (i32, i32) {
    %c0_i32 = arith.constant 0 : i32
    %c0_i32_0 = arith.constant 0 : i32
    %c0_i32_1 = arith.constant 0 : i32
    return %c0_i32, %c0_i32_0 : i32, i32
  }
  func.func @transform_2(%arg0: i32) -> (i32, i32) {
    %c0_i32 = arith.constant 0 : i32
    %c0_i32_0 = arith.constant 0 : i32
    return %arg0, %c0_i32 : i32, i32
  }
  func.func @transform_3(%arg0: i32) -> (i32, i32) {
    %c0_i32 = arith.constant 0 : i32
    %c0_i32_0 = arith.constant 0 : i32
    return %arg0, %c0_i32 : i32, i32
  }
}

</mosaic_0001>

<bundles_post_ra>
// kernel: tpu_custom_call.1
= control target key start
LH: loop header
LB: loop body
LE: loop exit
PB: predicated region body
PF: predicated region fallthrough
CT: control target
= control target key end

     0   :  { %8 = vsyncpa [#allocation3], 0  ;;  %s214_s0 = inlined_call_operand.hbm [shape: f32[2,8,32], index: 0, kind: input, shape index: {}]   ;;  %s215_s1 = inlined_call_operand.vmem [shape: f32[1,32], index: 1, kind: input, shape index: {}]   ;;  %s216_s2 = inlined_call_operand.vmem [shape: s32[2,1], index: 2, kind: input, shape index: {}]   ;;  %s217_s3 = inlined_call_operand.hbm [shape: f32[2,8], index: 3, kind: output, shape index: {}]  }
   0x1   :  { %9 = vsyncpa [#allocation4], 0  ;;  %s156_s12 = smov [#allocation2]   ;;  %s108_s16 = scalar_lea.hbm %s214_s0, 256 }
   0x2   :  { %s15_s13 = sshll.u32 %s156_s12, 4  ;;  %p109_p0 = scmp.ne.s32.totalorder %s214_s0, %s108_s16  ;;  %s16_s13 = int_to_ptr.vmem [resolvable:$true] %s15_s13 }
   0x3   :  { %p112_p1 = scmp.lt.u32.totalorder %s108_s16, %s214_s0 }
   0x5   :  { %p114_p2 = pnand %p112_p1, %p109_p0 }
   0x7   :  { %117 = shalt.err (!%p114_p2)
}
   0x8   :  { %s118_s21 = scalar_lea.vmem %s16_s13, 256  ;;  %p123_p4 = scmp.lt.s32.totalorder %s16_s13, %s16_s13 }
   0x9   :  { %p119_p3 = scmp.ne.s32.totalorder %s16_s13, %s118_s21  ;;  %p124_p5 = scmp.lt.s32.totalorder %s118_s21, %s118_s21 }
   0xb   :  { %p125_p6 = por %p124_p5, %p123_p4 }
   0xd   :  { %p126_p7 = pnand %p125_p6, %p119_p3 }
   0xf   :  { %129 = shalt.err (!%p126_p7)
}
  0x10   :  { %s157_s22 = smov 128   ;;  %s158_s23 = smov 8  }
  0x11   :  { %21 = dma.hbm_to_vmem [thread:$0]  %s214_s0, 256, %s16_s13, [#allocation3], %s157_s22, %s157_s22, %s158_s23  }
  0x12   :  { %152 = dma.done.wait [#allocation3], 256  }
  0x13   :  { %153 = vsyncadd [#allocation3], 4294967040  ;;  %v159_v0 = vmov 0   ;;  %v29_v1 = vld [vmem:[#allocation2] sm:$0xff]  ;;  %vm40_vm0 = vcmask 261120   ;;  %v30_v3 = vld [vmem:[#allocation2 + $0x8] sm:$0xff]  ;;  %v47_v9 = vlaneseq }
  0x14   :  { %102 = vset.pattern.permute.xlu1 %v159_v0  ;;  %103 = vset.pattern.permute.xlu0 %v159_v0  ;;  %v96_v2 = vld [vmem:[%s215_s1] ss:$0 sm:$0xff]  ;;  %vm64_vm1 = vcmask 1041409   ;;  %vm68_vm3 = vcmask 58368   ;;  %s160_s0 = smov [#allocation5]  }
  0x15   :  { %v38_v4 = vmul.f32 %v96_v2, %v29_v1  ;;  %v39_v5 = vmul.f32 %v96_v2, %v30_v3  ;;  %v49_v6 = vld [vmem:[%s216_s2] sm:$0x3]  ;;  %v48_v10 = vand.u32 127, %v47_v9  ;;  %v57_v11 = vshrl.u32 %v47_v9, 7  ;;  %s87_s1 = sshll.u32 %s160_s0, 4  ;;  %s88_s1 = int_to_ptr.vmem [resolvable:$true] %s87_s1 }
  0x16   :  { %51 = vperm.xlu1 %102, %v49_v6   ;;  %s130_s2 = scalar_lea.vmem %s88_s1, 32  ;;  %p135_p9 = scmp.lt.s32.totalorder %s88_s1, %s88_s1 }
  0x17   :  { %v41_v7 = vsel %vm40_vm0, %v38_v4, 0.0  ;;  %v44_v8 = vsel %vm40_vm0, %v39_v5, 0.0  ;;  %v58_v13 = vsub.s32 %v48_v10, %v57_v11  ;;  %p131_p8 = scmp.ne.s32.totalorder %s88_s1, %s130_s2  ;;  %p136_p10 = scmp.lt.s32.totalorder %s130_s2, %s130_s2 }
  0x18   :  { %42 = vadd.xlane.f32.xlu0 %v41_v7 }
  0x19   :  { %p137_p11 = por %p136_p10, %p135_p9 }
  0x1b   :  { %p138_p12 = pnand %p137_p11, %p131_p8 }
  0x1c   :  { %45 = vadd.xlane.f32.xlu0 %v44_v8 }
  0x95   :  { %v52_v14 = vpop.permute.xlu1 %51 }
  0x96   :  { %vm53_vm2 = vcmp.ge.s32.totalorder %v48_v10, %v52_v14 }
  0xa5   :  { %v43_v12 = vpop.xlane.xlu0 %42 }
  0xa6   :  { %v59_v16 = vrot.slane %v43_v12, %v58_v13 }
  0xa9   :  { %v46_v15 = vpop.xlane.xlu0 %45 }
  0xaa   :  { %v63_v17 = vrot.slane %v46_v15, %v58_v13 }
  0xac   :  { %v65_v18 = vsel %vm64_vm1, %v63_v17, %v59_v16 }
  0xad   :  { %v67_v19 = vsel %vm53_vm2, -inf, %v65_v18 }
  0xae   :  { %v69_v20 = vsel %vm68_vm3, %v67_v19, -inf }
  0xaf   :  { %70 = vmax.xlane.f32.xlu1 %v69_v20 }
 0x13c   :  { %v71_v21 = vpop.xlane.xlu1 %70 }
 0x13d   :  { %v72_v22 = vsub.f32 %v67_v19, %v71_v21 }
 0x13f   :  { %v73_v23 = vmul.f32 1.442695, %v72_v22 }
 0x141   :  { %104 = vpow2.f32 %v73_v23 }
 0x14b   :  { %v105_v24 = vpop.eup %104 }
 0x14c   :  { %v75_v25 = vsel %vm68_vm3, %v105_v24, 0.0 }
 0x14d   :  { %76 = vadd.xlane.f32.xlu0 %v75_v25 }
 0x1da   :  { %v77_v26 = vpop.xlane.xlu0 %76 }
 0x1db   :  { %106 = vrcp.f32 %v77_v26 }
 0x1e5   :  { %v107_v27 = vpop.eup %106 }
 0x1e6   :  { %v79_v28 = vmul.f32 %v107_v27, %v105_v24 }
 0x1e8   :  { %80 = vst.msk [vmem:[#allocation5] sm:$0x3] %vm68_vm3, %v79_v28 }
 0x1e9   :  { %141 = shalt.err (!%p138_p12)
}
 0x1ea   :  { %s142_s5 = scalar_lea.hbm %s217_s3, 32 }
 0x1eb   :  { %p143_p13 = scmp.ne.s32.totalorder %s217_s3, %s142_s5  ;;  %p146_p0 = scmp.lt.u32.totalorder %s142_s5, %s217_s3 }
 0x1ed   :  { %p148_p1 = pnand %p146_p0, %p143_p13 }
 0x1ef   :  { %151 = shalt.err (!%p148_p1)
}
 0x1f0   :  { %90 = dma.vmem_to_hbm [thread:$0]  %s88_s1, 32, %s217_s3, [#allocation4]  }
 0x1f1   :  { %154 = dma.done.wait [#allocation4], 32  }
 0x1f2   :  { %155 = vsyncadd [#allocation4], 4294967264 }
 0x1f3   :  { %94 = vsyncpa [#allocation3], 1 }
 0x1f4   :  { %95 = vsyncpa [#allocation4], 1 }

</bundles_post_ra>
